<compile_context>
chip_gen: v7x
topology: tpu7x:2x2x1
jax: 0.10.0
libtpu: 0.0.40
codegen_flags: <defaults>
</compile_context>

<pallas_src>
import jax
import jax.numpy as jnp
from jax.experimental import pallas as pl
from jax.experimental.pallas import tpu as pltpu


_LANE = 128
_TARGET_BLOCK_BYTES = 4 << 20  # ~4 MiB per input block per grid step


def _make_dice_kernel(hw, ts, need_mask):
    """Kernel closed over static spatial extent, row-tile size and mask gate."""

    def kernel(x_ref, y_ref, inse_ref, lr_ref):
        t = pl.program_id(1)

        # Per-b output blocks act as resident accumulators across the t axis.
        @pl.when(t == 0)
        def _init():
            inse_ref[...] = jnp.zeros_like(inse_ref)
            lr_ref[...] = jnp.zeros_like(lr_ref)

        x = x_ref[...].astype(jnp.float32)  # (C, TS, 128)
        y = y_ref[...].astype(jnp.float32)  # (C, TS, 128)

        if need_mask:
            # Only emitted when the grid over-covers HW (partial last block /
            # wrapper padding). Padded positions hold garbage or zeros; the
            # softmax of those would pollute sum(p*p), so p and y get masked.
            row = jax.lax.broadcasted_iota(jnp.int32, x.shape, 1)
            lane = jax.lax.broadcasted_iota(jnp.int32, x.shape, 2)
            pos = (t * ts + row) * _LANE + lane
            valid = pos < hw
            y = jnp.where(valid, y, 0.0)

        # Channel softmax == nn.Softmax(dim=1) on NCHW. Channel is the leading
        # (untiled) block axis, so max/sum over it are plain VPU ops on fully
        # packed (TS, 128) vregs; exp goes to the EUP.
        m = jnp.max(x, axis=0, keepdims=True)           # (1, TS, 128)
        e = jnp.exp(x - m)                               # (C, TS, 128)
        # Exact divide kept (approx reciprocal risks the 1e-5 check).
        p = e / jnp.sum(e, axis=0, keepdims=True)        # (C, TS, 128)
        if need_mask:
            p = jnp.where(valid, p, 0.0)

        # Reduce this block over its spatial rows in registers, then a single
        # narrow (C, 128) += — no tile-wide accumulator traffic per step.
        inse_ref[...] += jnp.sum(p * y, axis=1)          # (C, 128)
        lr_ref[...] += jnp.sum(p * p + y * y, axis=1)    # (C, 128)

    return kernel


def dice_loss(logits, label):
    """Pallas equivalent of Dice_Loss().forward(logits, label).

    logits, label: (B, C, H, W) arrays (NCHW, like PyTorch; f32 or bf16).
    Returns a scalar float32 loss.
    """
    B, C, H, W = label.shape
    hw = H * W

    # Free reshape: NCHW -> (B, C, H*W).
    x = logits.reshape(B, C, hw)
    y = label.reshape(B, C, hw)

    # Spatial-on-(sublanes, lanes) layout: (B, C, HW/128, 128).
    if hw % _LANE != 0:
        # Rare fallback (HW not a multiple of 128): one-time pad so the free
        # 4-D view exists. Padded positions are masked in-kernel.
        pad = _LANE - hw % _LANE
        x = jnp.pad(x, ((0, 0), (0, 0), (0, pad)))
        y = jnp.pad(y, ((0, 0), (0, 0), (0, pad)))
    n_rows = x.shape[-1] // _LANE
    x = x.reshape(B, C, n_rows, _LANE)
    y = y.reshape(B, C, n_rows, _LANE)

    # Row-tile so each input block is ~4 MiB (or the whole extent if smaller).
    itemsize = max(x.dtype.itemsize, y.dtype.itemsize)
    ts_cap = max(8, (_TARGET_BLOCK_BYTES // (C * _LANE * itemsize)) // 8 * 8)
    ts = n_rows if n_rows <= ts_cap else ts_cap
    n_t = pl.cdiv(n_rows, ts)
    need_mask = (n_t * ts * _LANE) != hw  # static: grid over-covers HW?

    kernel = _make_dice_kernel(hw, ts, need_mask)

    inse_p, lr_p = pl.pallas_call(
        kernel,
        out_shape=(
            jax.ShapeDtypeStruct((B, C, _LANE), jnp.float32),
            jax.ShapeDtypeStruct((B, C, _LANE), jnp.float32),
        ),
        grid_spec=pltpu.PrefetchScalarGridSpec(
            num_scalar_prefetch=0,
            grid=(B, n_t),
            in_specs=[
                pl.BlockSpec((None, C, ts, _LANE), lambda b, t: (b, 0, t, 0)),
                pl.BlockSpec((None, C, ts, _LANE), lambda b, t: (b, 0, t, 0)),
            ],
            out_specs=[
                pl.BlockSpec((None, C, _LANE), lambda b, t: (b, 0, 0)),
                pl.BlockSpec((None, C, _LANE), lambda b, t: (b, 0, 0)),
            ],
        ),
        compiler_params=pltpu.CompilerParams(
            # Per-b partial outputs make the batch axis safe to parallelize
            # (v7x megacore); t is the per-b reduction axis.
            dimension_semantics=("parallel", "arbitrary"),
            vmem_limit_bytes=40 * 1024 * 1024,
        ),
    )(x, y)

    # Tiny combine (pure JAX): sum partials over batch and lanes, then dice.
    eps = jnp.float32(1e-07)
    inse_c = jnp.sum(inse_p, axis=(0, 2))            # (C,)
    lr_c = jnp.sum(lr_p, axis=(0, 2))                # (C,)  == l + r
    dice = jnp.sum((2.0 * inse_c + eps) / (lr_c + eps))
    # torch.mean(dice) of a 0-d tensor is the value itself.
    return 1.0 - dice / jnp.float32(C)


def _dice_loss_ref(logits, label):
    """Pure-JAX reference mirroring the PyTorch code (for verification)."""
    eps = 1e-07
    _, C, _, _ = label.shape
    p = jax.nn.softmax(logits.astype(jnp.float32), axis=1)
    y = label.astype(jnp.float32)
    dice = 0.0
    for i in range(C):
        inse = jnp.sum(p[:, i] * y[:, i])
        l = jnp.sum(p[:, i] * p[:, i])
        r = jnp.sum(y[:, i] * y[:, i])
        dice += (2.0 * inse + eps) / (l + r + eps)
    return 1.0 - dice / C


def _run_case(key, B, C, H, W):
    k1, k2 = jax.random.split(key)
    logits = jax.random.normal(k1, (B, C, H, W), dtype=jnp.float32)
    cls = jax.random.randint(k2, (B, H, W), 0, C)
    label = jax.nn.one_hot(cls, C, dtype=jnp.float32)   # (B, H, W, C)
    label = jnp.transpose(label, (0, 3, 1, 2))           # (B, C, H, W)

    loss = dice_loss(logits, label)
    jax.block_until_ready(loss)

    ref = _dice_loss_ref(logits, label)
    assert jnp.allclose(loss, ref, atol=1e-5, rtol=1e-5), (loss, ref)


if __name__ == "__main__":
    key = jax.random.PRNGKey(0)
    ka, kb = jax.random.split(key)

    # Main case: HW divisible by 128 -> unmasked fast path.
    _run_case(ka, B=2, C=4, H=16, W=16)
    # Odd spatial extent: exercises the padded + masked fallback path.
    _run_case(kb, B=2, C=4, H=10, W=10)

    print("KERNEL_OK")
</pallas_src>

<mosaic_0001>
module attributes {stable_mosaic.version = 11 : i64} {
  func.func @kernel(%arg0: i32, %arg1: i32, %arg2: memref<1x4x2x128xf32, #tpu.memory_space<vmem>>, %arg3: memref<1x4x2x128xf32, #tpu.memory_space<vmem>>, %arg4: memref<1x4x128xf32, #tpu.memory_space<vmem>>, %arg5: memref<1x4x128xf32, #tpu.memory_space<vmem>>) attributes {dimension_semantics = [#tpu.dimension_semantics<parallel>, #tpu.dimension_semantics<arbitrary>], iteration_bounds = array<i64: 2, 1>, scalar_prefetch = 0 : i64, scratch_operands = 0 : i64, tpu.core_type = #tpu.core_type<tc>, window_params = [{transform_indices = @transform_0, window_bounds = array<i64: 1, 4, 2, 128>}, {transform_indices = @transform_1, window_bounds = array<i64: 1, 4, 2, 128>}, {transform_indices = @transform_2, window_bounds = array<i64: 1, 4, 128>}, {transform_indices = @transform_3, window_bounds = array<i64: 1, 4, 128>}]} {
    %c0_i32 = arith.constant 0 : i32
    %0 = arith.cmpi eq, %arg1, %c0_i32 : i32
    %1 = arith.extui %0 : i1 to i32
    %c0_i32_0 = arith.constant 0 : i32
    %2 = arith.cmpi ne, %1, %c0_i32_0 : i32
    scf.if %2 {
      %cst_23 = arith.constant 0.000000e+00 : f32
      %34 = vector.broadcast %cst_23 : f32 to vector<4x128xf32>
      %c0_24 = arith.constant 0 : index
      %c0_25 = arith.constant 0 : index
      %c0_26 = arith.constant 0 : index
      %35 = vector.load %arg4[%c0_24, %c0_25, %c0_26] : memref<1x4x128xf32, #tpu.memory_space<vmem>>, vector<1x4x128xf32>
      %36 = vector.shape_cast %35 : vector<1x4x128xf32> to vector<4x128xf32>
      %37 = vector.shape_cast %34 : vector<4x128xf32> to vector<1x4x128xf32>
      tpu.vector_store %arg4[%c0_24, %c0_25, %c0_26], %37 {strides = array<i32>} : memref<1x4x128xf32, #tpu.memory_space<vmem>>, vector<1x4x128xf32>,
      %cst_27 = arith.constant 0.000000e+00 : f32
      %38 = vector.broadcast %cst_27 : f32 to vector<4x128xf32>
      %c0_28 = arith.constant 0 : index
      %c0_29 = arith.constant 0 : index
      %c0_30 = arith.constant 0 : index
      %39 = vector.load %arg5[%c0_28, %c0_29, %c0_30] : memref<1x4x128xf32, #tpu.memory_space<vmem>>, vector<1x4x128xf32>
      %40 = vector.shape_cast %39 : vector<1x4x128xf32> to vector<4x128xf32>
      %41 = vector.shape_cast %38 : vector<4x128xf32> to vector<1x4x128xf32>
      tpu.vector_store %arg5[%c0_28, %c0_29, %c0_30], %41 {strides = array<i32>} : memref<1x4x128xf32, #tpu.memory_space<vmem>>, vector<1x4x128xf32>,
    } else {
    }
    %c0 = arith.constant 0 : index
    %c0_1 = arith.constant 0 : index
    %c0_2 = arith.constant 0 : index
    %c0_3 = arith.constant 0 : index
    %3 = vector.load %arg2[%c0, %c0_1, %c0_2, %c0_3] : memref<1x4x2x128xf32, #tpu.memory_space<vmem>>, vector<1x4x2x128xf32>
    %4 = vector.shape_cast %3 : vector<1x4x2x128xf32> to vector<4x2x128xf32>
    %c0_4 = arith.constant 0 : index
    %c0_5 = arith.constant 0 : index
    %c0_6 = arith.constant 0 : index
    %c0_7 = arith.constant 0 : index
    %5 = vector.load %arg3[%c0_4, %c0_5, %c0_6, %c0_7] : memref<1x4x2x128xf32, #tpu.memory_space<vmem>>, vector<1x4x2x128xf32>
    %6 = vector.shape_cast %5 : vector<1x4x2x128xf32> to vector<4x2x128xf32>
    %cst = arith.constant dense<0xFF800000> : vector<2x128xf32>
    %7 = vector.multi_reduction <maximumf>, %4, %cst [0] : vector<4x2x128xf32> to vector<2x128xf32>
    %8 = vector.shape_cast %7 : vector<2x128xf32> to vector<1x2x128xf32>
    %9 = vector.broadcast %8 : vector<1x2x128xf32> to vector<4x2x128xf32>
    %10 = arith.subf %4, %9 : vector<4x2x128xf32>
    %11 = math.exp %10 : vector<4x2x128xf32>
    %cst_8 = arith.constant dense<0.000000e+00> : vector<2x128xf32>
    %12 = vector.multi_reduction <add>, %11, %cst_8 [0] : vector<4x2x128xf32> to vector<2x128xf32>
    %13 = vector.shape_cast %12 : vector<2x128xf32> to vector<1x2x128xf32>
    %14 = vector.broadcast %13 : vector<1x2x128xf32> to vector<4x2x128xf32>
    %15 = arith.divf %11, %14 : vector<4x2x128xf32>
    %c0_9 = arith.constant 0 : index
    %c0_10 = arith.constant 0 : index
    %c0_11 = arith.constant 0 : index
    %16 = vector.load %arg4[%c0_9, %c0_10, %c0_11] : memref<1x4x128xf32, #tpu.memory_space<vmem>>, vector<1x4x128xf32>
    %17 = vector.shape_cast %16 : vector<1x4x128xf32> to vector<4x128xf32>
    %18 = arith.mulf %15, %6 : vector<4x2x128xf32>
    %cst_12 = arith.constant dense<0.000000e+00> : vector<4x128xf32>
    %19 = vector.multi_reduction <add>, %18, %cst_12 [1] : vector<4x2x128xf32> to vector<4x128xf32>
    %20 = arith.addf %17, %19 : vector<4x128xf32>
    %c0_13 = arith.constant 0 : index
    %c0_14 = arith.constant 0 : index
    %c0_15 = arith.constant 0 : index
    %21 = vector.load %arg4[%c0_13, %c0_14, %c0_15] : memref<1x4x128xf32, #tpu.memory_space<vmem>>, vector<1x4x128xf32>
    %22 = vector.shape_cast %21 : vector<1x4x128xf32> to vector<4x128xf32>
    %23 = vector.shape_cast %20 : vector<4x128xf32> to vector<1x4x128xf32>
    tpu.vector_store %arg4[%c0_13, %c0_14, %c0_15], %23 {strides = array<i32>} : memref<1x4x128xf32, #tpu.memory_space<vmem>>, vector<1x4x128xf32>,
    %c0_16 = arith.constant 0 : index
    %c0_17 = arith.constant 0 : index
    %c0_18 = arith.constant 0 : index
    %24 = vector.load %arg5[%c0_16, %c0_17, %c0_18] : memref<1x4x128xf32, #tpu.memory_space<vmem>>, vector<1x4x128xf32>
    %25 = vector.shape_cast %24 : vector<1x4x128xf32> to vector<4x128xf32>
    %26 = arith.mulf %15, %15 : vector<4x2x128xf32>
    %27 = arith.mulf %6, %6 : vector<4x2x128xf32>
    %28 = arith.addf %26, %27 : vector<4x2x128xf32>
    %cst_19 = arith.constant dense<0.000000e+00> : vector<4x128xf32>
    %29 = vector.multi_reduction <add>, %28, %cst_19 [1] : vector<4x2x128xf32> to vector<4x128xf32>
    %30 = arith.addf %25, %29 : vector<4x128xf32>
    %c0_20 = arith.constant 0 : index
    %c0_21 = arith.constant 0 : index
    %c0_22 = arith.constant 0 : index
    %31 = vector.load %arg5[%c0_20, %c0_21, %c0_22] : memref<1x4x128xf32, #tpu.memory_space<vmem>>, vector<1x4x128xf32>
    %32 = vector.shape_cast %31 : vector<1x4x128xf32> to vector<4x128xf32>
    %33 = vector.shape_cast %30 : vector<4x128xf32> to vector<1x4x128xf32>
    tpu.vector_store %arg5[%c0_20, %c0_21, %c0_22], %33 {strides = array<i32>} : memref<1x4x128xf32, #tpu.memory_space<vmem>>, vector<1x4x128xf32>,
    return
  }
  func.func @transform_0(%arg0: i32, %arg1: i32) -> (i32, i32, i32, i32) {
    %c0_i32 = arith.constant 0 : i32
    %c0_i32_0 = arith.constant 0 : i32
    %c0_i32_1 = arith.constant 0 : i32
    return %arg0, %c0_i32, %arg1, %c0_i32_0 : i32, i32, i32, i32
  }
  func.func @transform_1(%arg0: i32, %arg1: i32) -> (i32, i32, i32, i32) {
    %c0_i32 = arith.constant 0 : i32
    %c0_i32_0 = arith.constant 0 : i32
    %c0_i32_1 = arith.constant 0 : i32
    return %arg0, %c0_i32, %arg1, %c0_i32_0 : i32, i32, i32, i32
  }
  func.func @transform_2(%arg0: i32, %arg1: i32) -> (i32, i32, i32) {
    %c0_i32 = arith.constant 0 : i32
    %c0_i32_0 = arith.constant 0 : i32
    %c0_i32_1 = arith.constant 0 : i32
    return %arg0, %c0_i32, %c0_i32_0 : i32, i32, i32
  }
  func.func @transform_3(%arg0: i32, %arg1: i32) -> (i32, i32, i32) {
    %c0_i32 = arith.constant 0 : i32
    %c0_i32_0 = arith.constant 0 : i32
    %c0_i32_1 = arith.constant 0 : i32
    return %arg0, %c0_i32, %c0_i32_0 : i32, i32, i32
  }
}

</mosaic_0001>

<bundles_post_ra>
// kernel: tpu_custom_call.1
= control target key start
LH: loop header
LB: loop body
LE: loop exit
PB: predicated region body
PF: predicated region fallthrough
CT: control target
= control target key end

     0   :  { %9 = vsyncpa [#allocation3], 0  ;;  %s1195_s0 = inlined_call_operand.hbm [shape: f32[2,4,2,128], index: 0, kind: input, shape index: {}]   ;;  %s1196_s1 = inlined_call_operand.hbm [shape: f32[2,4,2,128], index: 1, kind: input, shape index: {}]   ;;  %s1197_s2 = inlined_call_operand.hbm [shape: f32[2,4,128], index: 2, kind: output, shape index: {0}]   ;;  %s1198_s3 = inlined_call_operand.hbm [shape: f32[2,4,128], index: 3, kind: output, shape index: {1}]  }
   0x1   :  { %11 = vsyncpa [#allocation3 + $0x1], 0 }
   0x2   :  { %12 = vsyncpa [#allocation6], 0 }
   0x3   :  { %14 = vsyncpa [#allocation6 + $0x1], 0 }
   0x4   :  { %15 = vsyncpa [#allocation4], 0 }
   0x5   :  { %17 = vsyncpa [#allocation4 + $0x1], 0 }
   0x6   :  { %18 = vsyncpa [#allocation9], 0 }
   0x7   :  { %20 = vsyncpa [#allocation9 + $0x1], 0  ;;  %s885_s12 = smov 0   ;;  %s887_s13 = smov 0  }
   0x8   :  { %s889_s14 = smov 0   ;;  %s891_s15 = smov 0  }
   0x9   :  { %s893_s16 = smov 0   ;;  %s895_s17 = smov 0  }
   0xa LB: > { %s570_s18 = sadd.s32 4294967295, %s856_s17   ;;  %s571_s19 = sadd.s32 4294967294, %s856_s17   ;;  %s856_s17 = sphi %s895_s17, %s26_s17   ;;  %s852_s16 = sphi %s893_s16, %s1216_s16   ;;  %s848_s15 = sphi %s891_s15, %s1215_s15   ;;  %s844_s14 = sphi %s889_s14, %s1214_s14   ;;  %s840_s13 = sphi %s887_s13, %s1213_s13   ;;  %s836_s12 = sphi %s885_s12, %s1212_s12  }
   0xb   : > { %s38_s20 = sadd.s32 1, %s852_s16  ;;  %s47_s21 = sadd.s32 1, %s844_s14 }
   0xc   : > { %p40_p0 = scmp.ge.s32.totalorder %s38_s20, 2  ;;  %p54_p1 = scmp.ne.s32.totalorder %s844_s14, %s840_s13 }
   0xd   : > { %p55_p2 = scmp.eq.s32.totalorder %s856_s17, 0  ;;  %p60_p3 = scmp.ne.s32.totalorder %s840_s13, %s836_s12 }
   0xe   : > { %s1218_s20 = smov (%p40_p0, %s38_s20), 0  ;;  %p61_p5 = scmp.eq.s32.totalorder %s570_s18, 0 }
   0xf   : > { %p926_p4 = por %p55_p2, %p54_p1  ;;  %s42_s23 = ssub.s32 %s852_s16, %s1218_s20 }
  0x10   : > { %p112_p6 = scmp.eq.s32.totalorder %s570_s18, 1  ;;  %p45_p7 = scmp.eq.s32.totalorder %s42_s23, 0 }
  0x11   : > { %p932_p8 = por %p61_p5, %p60_p3  ;;  %p118_p10 = scmp.eq.s32.totalorder %s571_s19, 1 }
  0x12   : > { %p936_p9 = por %p112_p6, %p54_p1  ;;  %p615_p13 = scmp.lt.s32.totalorder %s856_s17, 2 }
  0x13   : > { %s1202_s24 = scalar_select %p932_p8, 1, 0 }
  0x14   : > { %s1203_s25 = scalar_select %p936_p9, 1, 0 }
  0x15   : > { %s941_s26 = scalar_select %p45_p7, %s844_s14, %s47_s21  }
  0x16   : > { %p943_p11 = por %p118_p10, %p60_p3  ;;  %s950_s28 = sand.u32 1, %s844_s14  }
  0x17   : > { %s574_s29 = sshll.u32 %s950_s28, 3  ;;  %s591_s30 = sshll.u32 %s852_s16, 7 }
  0x18   : > { %s1204_s27 = scalar_select %p943_p11, 1, 0 }
  0x19   : > { %s959_s6 = scalar_lea.hbm %s1195_s0, %s591_s30  ;;  %s168_s7 = scalar_lea.vmem [#allocation2], %s574_s29 }
  0x1a   : > { %s176_s8 = sshll.u32 %s168_s7, 4  ;;  %p967_p0 = pnand %p615_p13, %p926_p4  ;;  %s963_s8 = int_to_ptr.vmem [resolvable:$true] %s176_s8 }
  0x1b   : > { %s165_s10 = scalar_lea.sflag [#allocation3], %s950_s28  ;;  %s678_s11 = scalar_lea.hbm %s959_s6, 128 }
  0x1c   : > { %p679_p2 = scmp.ne.s32.totalorder %s959_s6, %s678_s11  ;;  %p680_p3 = pneg %p967_p0 }
  0x1d   : > { %s683_s21 = scalar_lea.hbm %s1195_s0, 256  ;;  %p684_p4 = scmp.lt.u32.totalorder %s959_s6, %s1195_s0 }
  0x1e   : > { %p681_p5 = pnand %p680_p3, %p679_p2  ;;  %p685_p7 = scmp.lt.u32.totalorder %s683_s21, %s678_s11 }
  0x1f   : > { %p687_p13 = scmp.lt.u32.totalorder %s678_s11, %s959_s6 }
  0x20   : > { %p682_p6 = pneg %p681_p5  ;;  %p686_p10 = por %p685_p7, %p684_p4 }
  0x22   : > { %p688_p12 = por %p687_p13, %p686_p10 }
  0x24   : > { %p689_p1 = pnand %p688_p12, %p682_p6 }
  0x26   : > { %692 = shalt.err (!%p689_p1)
}
  0x27   : > { %s693_s4 = scalar_lea.vmem %s963_s8, 128  ;;  %s858_s5 = smov [#allocation2]  }
  0x28   : > { %p694_p2 = scmp.ne.s32.totalorder %s963_s8, %s693_s4  ;;  %s698_s7 = sshll.u32 %s858_s5, 4  ;;  %s699_s7 = int_to_ptr.vmem [resolvable:$false] %s698_s7 }
  0x29   : > { %s700_s18 = scalar_lea.vmem %s699_s7, 256  ;;  %p701_p9 = scmp.lt.s32.totalorder %s963_s8, %s699_s7 }
  0x2a   : > { %p696_p5 = pnand %p694_p2, %p680_p3  ;;  %p702_p4 = scmp.lt.s32.totalorder %s700_s18, %s693_s4 }
  0x2c   : > { %p697_p11 = pneg %p696_p5  ;;  %p703_p7 = por %p702_p4, %p701_p9 }
  0x2e   : > { %p704_p10 = pnand %p703_p7, %p697_p11 }
  0x30   : > { %707 = shalt.err (!%p704_p10)
}
  0x31   : > { %s859_s11 = smov 32   ;;  %s860_s19 = smov 2  }
  0x32   : > { %604 = dma.hbm_to_vmem [thread:$0]  (!%p967_p0), %s959_s6, 128, %s963_s8, %s165_s10, %s859_s11, %s859_s11, %s860_s19  }
  0x33   : > { %p206_p9 = scmp.lt.s32.totalorder %s856_s17, 3  ;;  %s1009_s23 = scalar_lea.hbm %s1196_s1, %s591_s30 }
  0x34   : > { %p1206_p11 = scmp.ge.s32.totalorder %s856_s17, 1  ;;  %s190_s5 = scalar_lea.vmem [#allocation5], %s574_s29 }
  0x35   : > { %s198_s7 = sshll.u32 %s190_s5, 4  ;;  %s187_s6 = scalar_lea.sflag [#allocation6], %s950_s28  ;;  %s1019_s7 = int_to_ptr.vmem [resolvable:$true] %s198_s7 }
  0x36   : > { %p1013_p12 = pnand %p1206_p11, %p206_p9  ;;  %s708_s8 = scalar_lea.hbm %s1009_s23, 128 }
  0x37   : > { %p709_p1 = scmp.ne.s32.totalorder %s1009_s23, %s708_s8  ;;  %s713_s18 = scalar_lea.hbm %s1196_s1, 256 }
  0x38   : > { %p714_p2 = scmp.lt.u32.totalorder %s1009_s23, %s1196_s1  ;;  %p715_p5 = scmp.lt.u32.totalorder %s713_s18, %s708_s8 }
  0x39   : > { %p711_p6 = pnand %p709_p1, %p680_p3  ;;  %p717_p7 = scmp.lt.u32.totalorder %s708_s8, %s1009_s23 }
  0x3a   : > { %p716_p4 = por %p715_p5, %p714_p2 }
  0x3b   : > { %p712_p13 = pneg %p711_p6 }
  0x3c   : > { %p718_p10 = por %p717_p7, %p716_p4 }
  0x3e   : > { %p719_p9 = pnand %p718_p10, %p712_p13 }
  0x40   : > { %722 = shalt.err (!%p719_p9)
}
  0x41   : > { %s723_s29 = scalar_lea.vmem %s1019_s7, 128  ;;  %s861_s5 = smov [#allocation5]  }
  0x42   : > { %p724_p11 = scmp.ne.s32.totalorder %s1019_s7, %s723_s29  ;;  %s728_s30 = sshll.u32 %s861_s5, 4  ;;  %s729_s30 = int_to_ptr.vmem [resolvable:$false] %s728_s30 }
  0x43   : > { %s730_s10 = scalar_lea.vmem %s729_s30, 256  ;;  %p731_p8 = scmp.lt.s32.totalorder %s1019_s7, %s729_s30 }
  0x44   : > { %p726_p1 = pnand %p724_p11, %p680_p3  ;;  %p732_p2 = scmp.lt.s32.totalorder %s730_s10, %s723_s29 }
  0x46   : > { %p727_p6 = pneg %p726_p1  ;;  %p733_p5 = por %p732_p2, %p731_p8 }
  0x48   : > { %p734_p4 = pnand %p733_p5, %p727_p6 }
  0x4a   : > { %737 = shalt.err (!%p734_p4)
}
  0x4b   : > { %607 = dma.hbm_to_vmem [thread:$0]  (!%p967_p0), %s1009_s23, 128, %s1019_s7, %s187_s6, %s859_s11, %s859_s11, %s860_s19  }
  0x4c   : > { %210 = sbr.rel (%p1013_p12) target bundleno = 188 (0xbc), region = 28  ;;  %s1053_s8 = sand.u32 (!%p1013_p12), 1, %s840_s13  }
  0x4d   : > { %s581_s18 = sshll.u32 (!%p1013_p12), %s1053_s8, 3  ;;  %s213_s21 = scalar_lea.sflag (!%p1013_p12), [#allocation3], %s1053_s8 }
  0x4e   : > { %s216_s9 = scalar_lea.vmem (!%p1013_p12), [#allocation2], %s581_s18  ;;  %p1208_p8 = scmp.ne.s32.totalorder (!%p1013_p12), %s1202_s24, 0 }
  0x53   : > { %819 = dma.done.wait (%p1208_p8), %s213_s21, 128  }
  0x54   : > { %821 = vsyncadd (%p1208_p8), %s213_s21, 4294967168  ;;  %s222_s28 = scalar_lea.sflag [#allocation6], %s1053_s8  ;;  %s1062_s11 = scalar_lea.vmem [#allocation5], %s581_s18 }
  0x55   : > { %823 = dma.done.wait (%p1208_p8), %s222_s28, 128  }
  0x56   : > { %825 = vsyncadd (%p1208_p8), %s222_s28, 4294967168  ;;  %s583_s19 = sshll.u32 %s1053_s8, 2  ;;  %v862_v0 = vmov 0.0   ;;  %vm272_vm0 = vcmask 1041408   ;;  %v264_v1 = vld [vmem:[%s216_s9] sm:$0x3] }
  0x57   : > { %s1069_s23 = scalar_lea.vmem [#allocation7], %s583_s19  ;;  %s1072_s4 = scalar_lea.vmem [#allocation8], %s583_s19  ;;  %v265_v2 = vld [vmem:[%s216_s9 + $0x2] sm:$0x3]  ;;  %v266_v3 = vld [vmem:[%s216_s9 + $0x4] sm:$0x3] }
  0x58   : > { %262 = vst [vmem:[%s1069_s23] sm:$0xf] %v862_v0  ;;  %263 = vst [vmem:[%s1072_s4] sm:$0xf] %v862_v0  ;;  %v267_v4 = vld [vmem:[%s216_s9 + $0x6] sm:$0x3]  ;;  %v273_v5 = vsel %vm272_vm0, %v264_v1, -inf  ;;  %v274_v6 = vsel %vm272_vm0, %v265_v2, -inf }
  0x59   : > { %v275_v7 = vsel %vm272_vm0, %v266_v3, -inf  ;;  %v276_v8 = vsel %vm272_vm0, %v267_v4, -inf  ;;  %v277_v9 = vmax.f32 %v273_v5, %v274_v6  ;;  %v268_v31 = vld [vmem:[%s1062_s11] sm:$0x3]  ;;  %v269_v32 = vld [vmem:[%s1062_s11 + $0x2] sm:$0x3] }
  0x5a   : > { %v278_v10 = vmax.f32 %v275_v7, %v276_v8  ;;  %v270_v33 = vld [vmem:[%s1062_s11 + $0x4] sm:$0x3]  ;;  %v271_v34 = vld [vmem:[%s1062_s11 + $0x6] sm:$0x3]  ;;  %v355_v40 = vmul.f32 %v268_v31, %v268_v31  ;;  %v356_v41 = vmul.f32 %v269_v32, %v269_v32  ;;  %vm341_vm1 = vcmask 1041409   ;;  %s587_s24 = sshll.u32 %s848_s15, 6 }
  0x5b   : > { %v357_v42 = vmul.f32 %v270_v33, %v270_v33  ;;  %v358_v43 = vmul.f32 %v271_v34, %v271_v34  ;;  %vm343_vm2 = vcmask 1042434   ;;  %vm345_vm3 = vcmask 1043459   ;;  %s420_s7 = sshll.u32 %s1069_s23, 4  ;;  %s1106_s29 = scalar_lea.hbm %s1197_s2, %s587_s24  ;;  %s1108_s7 = int_to_ptr.vmem [resolvable:$true] %s420_s7 }
  0x5c   : > { %v279_v11 = vmax.f32 %v277_v9, %v278_v10  ;;  %s433_s5 = sshll.u32 %s1072_s4, 4  ;;  %s402_s30 = scalar_lea.sflag [#allocation4], %s1053_s8  ;;  %s1147_s5 = int_to_ptr.vmem [resolvable:$true] %s433_s5 }
  0x5d   : > { %s738_s10 = scalar_lea.vmem %s1108_s7, 64  ;;  %p1209_p3 = scmp.ne.s32.totalorder %s1203_s25, 0 }
  0x5e   : > { %v280_v12 = vsub.f32 %v264_v1, %v279_v11  ;;  %v281_v13 = vsub.f32 %v265_v2, %v279_v11  ;;  %v282_v14 = vsub.f32 %v266_v3, %v279_v11  ;;  %v283_v15 = vsub.f32 %v267_v4, %v279_v11  ;;  %p739_p0 = scmp.ne.s32.totalorder %s1108_s7, %s738_s10  ;;  %s863_s18 = smov [#allocation7]  }
  0x5f   : > { %s742_s21 = sshll.u32 %s863_s18, 4  ;;  %s743_s21 = int_to_ptr.vmem [resolvable:$false] %s742_s21 }
  0x60   : > { %v284_v16 = vmul.f32 1.442695, %v280_v12  ;;  %v286_v17 = vmul.f32 1.442695, %v281_v13  ;;  %v288_v18 = vmul.f32 1.442695, %v282_v14  ;;  %p740_p12 = pnand %p739_p0, %p1209_p3  ;;  %p745_p7 = scmp.lt.s32.totalorder %s1108_s7, %s743_s21 }
  0x61   : > { %v290_v19 = vmul.f32 1.442695, %v283_v15  ;;  %s744_s9 = scalar_lea.vmem %s743_s21, 128 }
  0x62   : > { %668 = vpow2.f32 %v284_v16  ;;  %p741_p13 = pneg %p740_p12  ;;  %p746_p10 = scmp.lt.s32.totalorder %s744_s9, %s738_s10 }
  0x63   : > { %670 = vpow2.f32 %v286_v17 }
  0x64   : > { %672 = vpow2.f32 %v288_v18  ;;  %p747_p9 = por %p746_p10, %p745_p7 }
  0x65   : > { %674 = vpow2.f32 %v290_v19 }
  0x66   : > { %p748_p11 = pnand %p747_p9, %p741_p13 }
  0x6c   : > { %v669_v20 = vpop.eup %668 }
  0x6d   : > { %v671_v21 = vpop.eup %670  ;;  %v292_v22 = vsel %vm272_vm0, %v669_v20, 0.0 }
  0x6e   : > { %v673_v23 = vpop.eup %672  ;;  %v293_v24 = vsel %vm272_vm0, %v671_v21, 0.0 }
  0x6f   : > { %v675_v25 = vpop.eup %674  ;;  %v294_v26 = vadd.f32 %v293_v24, %v292_v22  ;;  %v295_v27 = vsel %vm272_vm0, %v673_v23, 0.0 }
  0x70   : > { %v297_v28 = vsel %vm272_vm0, %v675_v25, 0.0 }
  0x71   : > { %v296_v29 = vadd.f32 %v295_v27, %v294_v26 }
  0x73   : > { %v298_v30 = vadd.f32 %v297_v28, %v296_v29 }
  0x75   : > { %676 = vrcp.f32 %v298_v30 }
  0x7f   : > { %v677_v35 = vpop.eup %676 }
  0x80   : > { %v300_v36 = vmul.f32 %v677_v35, %v669_v20  ;;  %v301_v37 = vmul.f32 %v677_v35, %v671_v21  ;;  %v302_v38 = vmul.f32 %v677_v35, %v673_v23  ;;  %v303_v39 = vmul.f32 %v677_v35, %v675_v25 }
  0x82   : > { %v305_v44 = vmul.f32 %v300_v36, %v268_v31  ;;  %v306_v45 = vmul.f32 %v301_v37, %v269_v32  ;;  %v307_v46 = vmul.f32 %v302_v38, %v270_v33  ;;  %v308_v47 = vmul.f32 %v303_v39, %v271_v34 }
  0x83   : > { %v351_v48 = vmul.f32 %v300_v36, %v300_v36  ;;  %v352_v49 = vmul.f32 %v301_v37, %v301_v37  ;;  %v353_v50 = vmul.f32 %v302_v38, %v302_v38  ;;  %v354_v51 = vmul.f32 %v303_v39, %v303_v39 }
  0x84   : > { %v309_v52 = vsel %vm272_vm0, %v305_v44, 0.0  ;;  %v316_v53 = vsel %vm272_vm0, %v306_v45, 0.0  ;;  %v323_v54 = vsel %vm272_vm0, %v307_v46, 0.0  ;;  %v330_v55 = vsel %vm272_vm0, %v308_v47, 0.0 }
  0x85   : > { %v310_v56 = vrot.slane %v309_v52, 4  ;;  %v317_v57 = vrot.slane %v316_v53, 4  ;;  %v324_v58 = vrot.slane %v323_v54, 4  ;;  %v331_v59 = vrot.slane %v330_v55, 4 }
  0x86   : > { %v359_v60 = vadd.f32 %v355_v40, %v351_v48  ;;  %v360_v61 = vadd.f32 %v356_v41, %v352_v49  ;;  %v361_v62 = vadd.f32 %v357_v42, %v353_v50  ;;  %v362_v63 = vadd.f32 %v358_v43, %v354_v51  ;;  %v304_v40 = vld [vmem:[%s1069_s23] sm:$0xf] }
  0x87   : > { %v311_v0 = vadd.f32 %v310_v56, %v309_v52  ;;  %v318_v1 = vadd.f32 %v317_v57, %v316_v53  ;;  %v325_v2 = vadd.f32 %v324_v58, %v323_v54  ;;  %v332_v3 = vadd.f32 %v331_v59, %v330_v55  ;;  %v350_v53 = vld [vmem:[%s1072_s4] sm:$0xf] }
  0x88   : > { %v363_v4 = vsel %vm272_vm0, %v359_v60, 0.0  ;;  %v370_v5 = vsel %vm272_vm0, %v360_v61, 0.0  ;;  %v377_v6 = vsel %vm272_vm0, %v361_v62, 0.0  ;;  %v384_v7 = vsel %vm272_vm0, %v362_v63, 0.0 }
  0x89   : > { %v312_v8 = vrot.slane %v311_v0, 2  ;;  %v319_v9 = vrot.slane %v318_v1, 2  ;;  %v326_v10 = vrot.slane %v325_v2, 2  ;;  %v333_v11 = vrot.slane %v332_v3, 2 }
  0x8a   : > { %v364_v12 = vrot.slane %v363_v4, 4  ;;  %v371_v13 = vrot.slane %v370_v5, 4  ;;  %v378_v14 = vrot.slane %v377_v6, 4  ;;  %v385_v15 = vrot.slane %v384_v7, 4 }
  0x8b   : > { %v313_v16 = vadd.f32 %v312_v8, %v311_v0  ;;  %v320_v17 = vadd.f32 %v319_v9, %v318_v1  ;;  %v327_v18 = vadd.f32 %v326_v10, %v325_v2  ;;  %v334_v19 = vadd.f32 %v333_v11, %v332_v3 }
  0x8c   : > { %v365_v20 = vadd.f32 %v364_v12, %v363_v4  ;;  %v372_v21 = vadd.f32 %v371_v13, %v370_v5  ;;  %v379_v22 = vadd.f32 %v378_v14, %v377_v6  ;;  %v386_v23 = vadd.f32 %v385_v15, %v384_v7 }
  0x8d   : > { %v314_v24 = vrot.slane %v313_v16, 1  ;;  %v321_v25 = vrot.slane %v320_v17, 1  ;;  %v328_v26 = vrot.slane %v327_v18, 1  ;;  %v335_v27 = vrot.slane %v334_v19, 1 }
  0x8e   : > { %v366_v28 = vrot.slane %v365_v20, 2  ;;  %v373_v29 = vrot.slane %v372_v21, 2  ;;  %v380_v30 = vrot.slane %v379_v22, 2  ;;  %v387_v31 = vrot.slane %v386_v23, 2 }
  0x8f   : > { %v315_v32 = vadd.f32 %v314_v24, %v313_v16  ;;  %v322_v33 = vadd.f32 %v321_v25, %v320_v17  ;;  %v329_v34 = vadd.f32 %v328_v26, %v327_v18  ;;  %v336_v35 = vadd.f32 %v335_v27, %v334_v19 }
  0x90   : > { %v367_v36 = vadd.f32 %v366_v28, %v365_v20  ;;  %v374_v37 = vadd.f32 %v373_v29, %v372_v21  ;;  %v381_v38 = vadd.f32 %v380_v30, %v379_v22  ;;  %v388_v39 = vadd.f32 %v387_v31, %v386_v23 }
  0x91   : > { %v342_v41 = vsel %vm341_vm1, %v322_v33, %v315_v32 }
  0x92   : > { %v344_v42 = vsel %vm343_vm2, %v329_v34, %v342_v41  ;;  %v368_v43 = vrot.slane %v367_v36, 1  ;;  %v375_v44 = vrot.slane %v374_v37, 1  ;;  %v382_v45 = vrot.slane %v381_v38, 1 }
  0x93   : > { %v346_v46 = vsel %vm345_vm3, %v336_v35, %v344_v42  ;;  %v389_v47 = vrot.slane %v388_v39, 1 }
  0x94   : > { %v348_v48 = vadd.f32 %v346_v46, %v304_v40  ;;  %v369_v49 = vadd.f32 %v368_v43, %v367_v36  ;;  %v376_v50 = vadd.f32 %v375_v44, %v374_v37  ;;  %v383_v51 = vadd.f32 %v382_v45, %v381_v38 }
  0x95   : > { %v390_v52 = vadd.f32 %v389_v47, %v388_v39 }
  0x96   : > { %349 = vst [vmem:[%s1069_s23] sm:$0xf] %v348_v48  ;;  %v395_v54 = vsel %vm341_vm1, %v376_v50, %v369_v49 }
  0x97   : > { %v396_v55 = vsel %vm343_vm2, %v383_v51, %v395_v54 }
  0x98   : > { %751 = shalt.err (!%p748_p11)
}
  0x99   : > { %s752_s28 = scalar_lea.hbm %s1106_s29, 64  ;;  %s756_s23 = scalar_lea.hbm %s1197_s2, 128 }
  0x9a   : > { %p753_p1 = scmp.ne.s32.totalorder %s1106_s29, %s752_s28  ;;  %p757_p5 = scmp.lt.u32.totalorder %s1106_s29, %s1197_s2 }
  0x9b   : > { %p758_p4 = scmp.lt.u32.totalorder %s756_s23, %s752_s28  ;;  %p760_p0 = scmp.lt.u32.totalorder %s752_s28, %s1106_s29 }
  0x9c   : > { %p754_p6 = pnand %p753_p1, %p1209_p3 }
  0x9d   : > { %p759_p8 = por %p758_p4, %p757_p5 }
  0x9e   : > { %p755_p2 = pneg %p754_p6 }
  0x9f   : > { %p761_p12 = por %p760_p0, %p759_p8 }
  0xa1   : > { %p762_p13 = pnand %p761_p12, %p755_p2 }
  0xa3   : > { %765 = shalt.err (!%p762_p13)
}
  0xa4   : > { %597 = dma.vmem_to_hbm [thread:$0]  (%p1209_p3), %s1108_s7, 64, %s1106_s29, %s402_s30   ;;  %v397_v56 = vsel %vm345_vm3, %v390_v52, %v396_v55 }
  0xa5   : > { %v399_v57 = vadd.f32 %v397_v56, %v350_v53  ;;  %s1143_s21 = scalar_lea.hbm %s1198_s3, %s587_s24  ;;  %s407_s9 = scalar_lea.sflag [#allocation9], %s1053_s8 }
  0xa6   : > { %s766_s28 = scalar_lea.vmem %s1147_s5, 64  ;;  %s864_s7 = smov [#allocation8]  }
  0xa7   : > { %400 = vst [vmem:[%s1072_s4] sm:$0xf] %v399_v57  ;;  %p767_p7 = scmp.ne.s32.totalorder %s1147_s5, %s766_s28  ;;  %s770_s15 = sshll.u32 %s864_s7, 4  ;;  %s771_s15 = int_to_ptr.vmem [resolvable:$false] %s770_s15 }
  0xa8   : > { %s772_s29 = scalar_lea.vmem %s771_s15, 128  ;;  %p773_p11 = scmp.lt.s32.totalorder %s1147_s5, %s771_s15 }
  0xa9   : > { %p768_p10 = pnand %p767_p7, %p1209_p3  ;;  %p774_p1 = scmp.lt.s32.totalorder %s772_s29, %s766_s28 }
  0xab   : > { %p769_p9 = pneg %p768_p10  ;;  %p775_p6 = por %p774_p1, %p773_p11 }
  0xad   : > { %p776_p2 = pnand %p775_p6, %p769_p9 }
  0xaf   : > { %779 = shalt.err (!%p776_p2)
}
  0xb0   : > { %s780_s8 = scalar_lea.hbm %s1143_s21, 64  ;;  %s784_s30 = scalar_lea.hbm %s1198_s3, 128 }
  0xb1   : > { %p781_p5 = scmp.ne.s32.totalorder %s1143_s21, %s780_s8  ;;  %p785_p0 = scmp.lt.u32.totalorder %s1143_s21, %s1198_s3 }
  0xb2   : > { %p786_p12 = scmp.lt.u32.totalorder %s784_s30, %s780_s8  ;;  %p788_p7 = scmp.lt.u32.totalorder %s780_s8, %s1143_s21 }
  0xb3   : > { %p782_p4 = pnand %p781_p5, %p1209_p3 }
  0xb4   : > { %p787_p13 = por %p786_p12, %p785_p0 }
  0xb5   : > { %p783_p8 = pneg %p782_p4 }
  0xb6   : > { %p789_p10 = por %p788_p7, %p787_p13 }
  0xb8   : > { %p790_p9 = pnand %p789_p10, %p783_p8 }
  0xba   : > { %793 = shalt.err (!%p790_p9)
}
  0xbb   : > { %598 = dma.vmem_to_hbm [thread:$0]  (%p1209_p3), %s1147_s5, 64, %s1143_s21, %s407_s9  }
  0xbc PF: > { %s445_s23 = sand.u32 1, %s836_s12   ;;  %p1210_p11 = scmp.ne.s32.totalorder %s1204_s27, 0 }
  0xbd   : > { %p1211_p1 = scmp.ge.s32.totalorder %s856_s17, 2  ;;  %s446_s6 = scalar_lea.sflag [#allocation4], %s445_s23 }
  0xbf   : > { %p609_p6 = pnand %p1211_p1, %p1210_p11 }
  0xc1   : > { %827 = dma.done.wait (!%p609_p6), %s446_s6, 64  }
  0xc2   : > { %829 = vsyncadd (!%p609_p6), %s446_s6, 4294967232  ;;  %s455_s22 = scalar_lea.sflag [#allocation9], %s445_s23 }
  0xc3   : > { %831 = dma.done.wait (!%p609_p6), %s455_s22, 64  }
  0xc4   : > { %833 = vsyncadd (!%p609_p6), %s455_s22, 4294967232  ;;  %s26_s17 = sadd.s32 1, %s856_s17   ;;  %s1212_s12 = smov %s840_s13 }
  0xc5   : > { %p23_p2 = scmp.ge.s32.totalorder %s26_s17, 4   ;;  %s1213_s13 = smov %s844_s14 }
  0xc6   : > { %s1214_s14 = smov %s941_s26  ;;  %s1215_s15 = smov %s852_s16 }
  0xc7   : > { %s1216_s16 = smov %s1218_s20  ;;  %25 = sbr.rel (!%p23_p2) target bundleno = 10 (0xa), region = 107 }
  0xce   :  { %460 = vsyncpa [#allocation3], 1 }
  0xcf   :  { %462 = vsyncpa [#allocation3 + $0x1], 1 }
  0xd0   :  { %463 = vsyncpa [#allocation6], 1 }
  0xd1   :  { %465 = vsyncpa [#allocation6 + $0x1], 1 }
  0xd2   :  { %466 = vsyncpa [#allocation4], 1 }
  0xd3   :  { %468 = vsyncpa [#allocation4 + $0x1], 1 }
  0xd4   :  { %469 = vsyncpa [#allocation9], 1 }
  0xd5   :  { %471 = vsyncpa [#allocation9 + $0x1], 1 }

</bundles_post_ra>
